<compile_context>
chip_gen: v6e
topology: v6e:2x2x1
jax: 0.10.0
libtpu: 0.0.40
codegen_flags: <defaults>
</compile_context>

<pallas_src>
import jax
import jax.numpy as jnp
from jax.experimental import pallas as pl
from jax.experimental.pallas import tpu as pltpu

LANES = 128
_TARGET_BLOCK_BYTES = 8 * 1024 * 1024   # ~8 MiB per block
_VMEM_LIMIT_BYTES = 48 << 20            # 4 x 8 MiB double-buffer + compiler scratch
_MIN_GRID_STEPS = 4                     # >= 2 blocks per v7x TensorCore
_MIN_BLOCK_ROWS = 512                   # keep blocks on the ~85% roofline plateau


def _param_relu_kernel(alpha_ref, x_ref, o_ref):
    # alpha is a (1, 1) f32 scalar in SMEM. Do the math in f32 (free: HBM-bound
    # kernel) so bf16/int inputs don't quantize/truncate alpha; cast on store.
    alpha = alpha_ref[0, 0]
    prod = alpha * x_ref[...].astype(jnp.float32)
    o_ref[...] = jnp.maximum(jnp.float32(0.0), prod).astype(o_ref.dtype)


def _packed_sublanes(dtype) -> int:
    # Sub-32-bit dtypes pack 2/4 rows per sublane; keep block rows aligned to
    # the packed tile so vector stores stay unmasked.
    itemsize = jnp.dtype(dtype).itemsize
    return 8 * max(1, 4 // itemsize)


def _round_up(x: int, m: int) -> int:
    return ((x + m - 1) // m) * m


def _block_rows_for(in_dtype, out_dtype, rows: int) -> int:
    per_row_bytes = LANES * max(
        jnp.dtype(in_dtype).itemsize, jnp.dtype(out_dtype).itemsize
    )
    cap = _TARGET_BLOCK_BYTES // per_row_bytes          # e.g. 16384 rows for f32
    sub = max(_packed_sublanes(in_dtype), _packed_sublanes(out_dtype))
    cap = max(sub, (cap // sub) * sub)

    if rows <= _MIN_BLOCK_ROWS:
        # Too small to benefit from splitting: one full-array block
        # (always a legal block shape even if rows % 8 != 0).
        return rows

    # Aim for >= _MIN_GRID_STEPS blocks (megacore sharding on v7x) but never
    # drop below the 512-row floor, and never exceed the ~8 MiB byte cap.
    split = max(_MIN_BLOCK_ROWS, pl.cdiv(rows, _MIN_GRID_STEPS))
    split = _round_up(split, sub)
    return min(cap, split)


def _param_relu_2d(x2d: jax.Array, alpha_f32: jax.Array, out_dtype) -> jax.Array:
    rows = x2d.shape[0]
    block_rows = _block_rows_for(x2d.dtype, out_dtype, rows)
    grid = (pl.cdiv(rows, block_rows),)   # ragged last block handled by Pallas

    n = rows * LANES
    cost = pl.CostEstimate(
        flops=2 * n,
        transcendentals=0,
        bytes_accessed=n
        * (jnp.dtype(x2d.dtype).itemsize + jnp.dtype(out_dtype).itemsize)
        + 4,
    )

    return pl.pallas_call(
        _param_relu_kernel,
        out_shape=jax.ShapeDtypeStruct((rows, LANES), out_dtype),
        grid_spec=pltpu.PrefetchScalarGridSpec(
            num_scalar_prefetch=0,
            grid=grid,
            in_specs=[
                pl.BlockSpec(memory_space=pltpu.MemorySpace.SMEM),   # alpha scalar
                pl.BlockSpec((block_rows, LANES), lambda i: (i, 0)),
            ],
            out_specs=pl.BlockSpec((block_rows, LANES), lambda i: (i, 0)),
        ),
        compiler_params=pltpu.CompilerParams(
            dimension_semantics=("parallel",),        # shards across v7x's 2 TCs
            vmem_limit_bytes=_VMEM_LIMIT_BYTES,
        ),
        cost_estimate=cost,
    )(alpha_f32.reshape(1, 1), x2d)


def param_relu(x: jax.Array, alpha: jax.Array) -> jax.Array:
    """Pallas implementation of max(0, alpha * x) for arbitrary-shaped x."""
    orig_shape = x.shape
    # PyTorch: f32 Parameter * x promotes (f32 out for bf16/int inputs).
    out_dtype = jnp.promote_types(x.dtype, jnp.float32)
    n = x.size
    alpha_f32 = jnp.asarray(alpha, dtype=jnp.float32)

    flat = x.reshape(-1)
    n_aligned = (n // LANES) * LANES
    tail = n - n_aligned

    if tail == 0:
        rows = n // LANES
        out2d = _param_relu_2d(flat.reshape(rows, LANES), alpha_f32, out_dtype)
        return out2d.reshape(orig_shape)

    # Unaligned: kernel on the lane-aligned prefix, plain-jnp for the <128-elem
    # tail, then stitch. Avoids padding/slicing the whole tensor (2 extra HBM
    # passes for a bandwidth-bound op).
    pieces = []
    if n_aligned > 0:
        rows = n_aligned // LANES
        prefix = _param_relu_2d(
            flat[:n_aligned].reshape(rows, LANES), alpha_f32, out_dtype
        )
        pieces.append(prefix.reshape(-1))
    tail_x = flat[n_aligned:].astype(jnp.float32)
    pieces.append(
        jnp.maximum(jnp.float32(0.0), alpha_f32 * tail_x).astype(out_dtype)
    )
    return jnp.concatenate(pieces).reshape(orig_shape)


if __name__ == "__main__":
    key = jax.random.PRNGKey(0)
    k1, k2 = jax.random.split(key)

    ok = True

    # NCHW activation; total size 2*4*16*16 = 2048 = 16*128 (lane-aligned path).
    x = jax.random.normal(k1, (2, 4, 16, 16), dtype=jnp.float32)
    for a in (1.0, 0.5, -0.75):   # torch default alpha=1.0 plus nontrivial alphas
        alpha = jnp.float32(a)
        y = param_relu(x, alpha)
        jax.block_until_ready(y)
        y_ref = jnp.maximum(0.0, alpha * x)
        ok &= (y.shape == x.shape) and (y.dtype == jnp.float32)
        ok &= bool(jnp.allclose(y, y_ref, atol=1e-6, rtol=1e-6))

    # Unaligned total size (3*5*17 = 255) exercises the prefix + tail path.
    x_u = jax.random.normal(k2, (3, 5, 17), dtype=jnp.float32)
    alpha = jnp.float32(0.5)
    y_u = param_relu(x_u, alpha)
    jax.block_until_ready(y_u)
    y_u_ref = jnp.maximum(0.0, alpha * x_u)
    ok &= (y_u.shape == x_u.shape) and (y_u.dtype == jnp.float32)
    ok &= bool(jnp.allclose(y_u, y_u_ref, atol=1e-6, rtol=1e-6))

    assert ok
    print("KERNEL_OK")
</pallas_src>

<mosaic_0001>
module attributes {stable_mosaic.version = 11 : i64} {
  func.func @_param_relu_kernel(%arg0: i32, %arg1: memref<1x1xf32, #tpu.memory_space<smem>>, %arg2: memref<16x128xf32, #tpu.memory_space<vmem>>, %arg3: memref<16x128xf32, #tpu.memory_space<vmem>>) attributes {dimension_semantics = [#tpu.dimension_semantics<parallel>], iteration_bounds = array<i64: 1>, scalar_prefetch = 0 : i64, scratch_operands = 0 : i64, tpu.core_type = #tpu.core_type<tc>, window_params = [{transform_indices = @transform_0, window_bounds = array<i64: 1, 1>}, {transform_indices = @transform_1, window_bounds = array<i64: 16, 128>}, {transform_indices = @transform_2, window_bounds = array<i64: 16, 128>}]} {
    %c0 = arith.constant 0 : index
    %c0_0 = arith.constant 0 : index
    %0 = memref.load %arg1[%c0, %c0_0] : memref<1x1xf32, #tpu.memory_space<smem>>
    %c0_1 = arith.constant 0 : index
    %c0_2 = arith.constant 0 : index
    %1 = vector.load %arg2[%c0_1, %c0_2] : memref<16x128xf32, #tpu.memory_space<vmem>>, vector<16x128xf32>
    %2 = vector.broadcast %0 : f32 to vector<16x128xf32>
    %3 = arith.mulf %2, %1 : vector<16x128xf32>
    %cst = arith.constant 0.000000e+00 : f32
    %4 = vector.broadcast %cst : f32 to vector<16x128xf32>
    %5 = arith.maximumf %4, %3 : vector<16x128xf32>
    %c0_3 = arith.constant 0 : index
    %c0_4 = arith.constant 0 : index
    %6 = vector.load %arg3[%c0_3, %c0_4] : memref<16x128xf32, #tpu.memory_space<vmem>>, vector<16x128xf32>
    tpu.vector_store %arg3[%c0_3, %c0_4], %5 {strides = array<i32>} : memref<16x128xf32, #tpu.memory_space<vmem>>, vector<16x128xf32>,
    return
  }
  func.func @transform_0(%arg0: i32) -> (i32, i32) {
    %c0_i32 = arith.constant 0 : i32
    %c0_i32_0 = arith.constant 0 : i32
    %c0_i32_1 = arith.constant 0 : i32
    return %c0_i32, %c0_i32_0 : i32, i32
  }
  func.func @transform_1(%arg0: i32) -> (i32, i32) {
    %c0_i32 = arith.constant 0 : i32
    %c0_i32_0 = arith.constant 0 : i32
    return %arg0, %c0_i32 : i32, i32
  }
  func.func @transform_2(%arg0: i32) -> (i32, i32) {
    %c0_i32 = arith.constant 0 : i32
    %c0_i32_0 = arith.constant 0 : i32
    return %arg0, %c0_i32 : i32, i32
  }
}

</mosaic_0001>

<bundles_post_ra>
// kernel: tpu_custom_call.1
= control target key start
LH: loop header
LB: loop body
LE: loop exit
PB: predicated region body
PF: predicated region fallthrough
CT: control target
= control target key end

     0   :  { %8 = vsyncpa [#allocation4], 0  ;;  %s130_s0 = inlined_call_operand.<no memory space> [shape: f32[1,1], index: 0, kind: input, shape index: {}]   ;;  %s131_s1 = inlined_call_operand.hbm [shape: f32[16,128], index: 1, kind: input, shape index: {}]   ;;  %s132_s2 = inlined_call_operand.hbm [shape: f32[16,128], index: 2, kind: output, shape index: {}]  }
   0x1   :  { %9 = vsyncpa [#allocation5], 0  ;;  %s102_s9 = smov [#allocation3]  }
   0x2   :  { %s17_s10 = sshll.u32 %s102_s9, 4  ;;  %s18_s10 = int_to_ptr.vmem [resolvable:$true] %s17_s10 }
   0x3   :  { %s66_s11 = scalar_lea.vmem %s18_s10, 256  ;;  %p71_p1 = scmp.lt.s32.totalorder %s18_s10, %s18_s10 }
   0x4   :  { %p67_p0 = scmp.ne.s32.totalorder %s18_s10, %s66_s11  ;;  %p72_p2 = scmp.lt.s32.totalorder %s66_s11, %s66_s11 }
   0x6   :  { %p73_p3 = por %p72_p2, %p71_p1 }
   0x8   :  { %p74_p4 = pnand %p73_p3, %p67_p0 }
   0xa   :  { %77 = shalt.err (!%p74_p4)
}
   0xb   :  { %s103_s12 = smov 128   ;;  %s104_s13 = smov 8  }
   0xc   :  { %23 = dma.hbm_to_vmem [thread:$0]  %s131_s1, 256, %s18_s10, [#allocation4], %s103_s12, %s103_s12, %s104_s13  }
   0xd   :  { %98 = dma.done.wait [#allocation4], 256  }
   0xe   :  { %99 = vsyncadd [#allocation4], 4294967040  ;;  %v30_v0 = vstv %s130_s0  ;;  %v28_v1 = vld [vmem:[#allocation3] sm:$0xff]  ;;  %v29_v2 = vld [vmem:[#allocation3 + $0x8] sm:$0xff]  ;;  %s105_s18 = smov [#allocation6]  }
   0xf   :  { %s42_s19 = sshll.u32 %s105_s18, 4  ;;  %v31_v3 = vmul.f32 %v30_v0, %v28_v1  ;;  %v32_v4 = vmul.f32 %v30_v0, %v29_v2  ;;  %s43_s19 = int_to_ptr.vmem [resolvable:$true] %s42_s19 }
  0x10   :  { %s78_s20 = scalar_lea.vmem %s43_s19, 256  ;;  %p83_p6 = scmp.lt.s32.totalorder %s43_s19, %s43_s19 }
  0x11   :  { %v33_v5 = vmax.f32 %v31_v3, 0.0  ;;  %v34_v6 = vmax.f32 %v32_v4, 0.0  ;;  %p79_p5 = scmp.ne.s32.totalorder %s43_s19, %s78_s20  ;;  %p84_p7 = scmp.lt.s32.totalorder %s78_s20, %s78_s20 }
  0x13   :  { %35 = vst [vmem:[#allocation6] sm:$0xff] %v33_v5  ;;  %36 = vst [vmem:[#allocation6 + $0x8] sm:$0xff] %v34_v6  ;;  %p85_p8 = por %p84_p7, %p83_p6 }
  0x15   :  { %p86_p9 = pnand %p85_p8, %p79_p5 }
  0x17   :  { %89 = shalt.err (!%p86_p9)
}
  0x18   :  { %48 = dma.vmem_to_hbm [thread:$0]  %s43_s19, 256, %s132_s2, [#allocation5], %s103_s12, %s103_s12, %s104_s13  }
  0x19   :  { %100 = dma.done.wait [#allocation5], 256  }
  0x1a   :  { %101 = vsyncadd [#allocation5], 4294967040 }
  0x1b   :  { %52 = vsyncpa [#allocation4], 1 }
  0x1c   :  { %53 = vsyncpa [#allocation5], 1 }

</bundles_post_ra>
